<compile_context>
chip_gen: v6e
topology: v6e:2x2x1
jax: 0.10.0
libtpu: 0.0.40
codegen_flags: <defaults>
</compile_context>

<pallas_src>
import jax
import jax.numpy as jnp
from jax.experimental import pallas as pl
from jax.experimental.pallas import tpu as pltpu


# ------------------------------- kernel -------------------------------------

def fused_highway_kernel(x_ref, wconv_ref, bconv_ref, wfcg_ref, bfcg_ref,
                         woutT_ref, bout_ref, out_ref, xpad_ref):
    # x_ref    : (S, D)         embedded tokens for this batch element
    # wconv_ref: (L, K*D, D)    conv weights in im2col layout [l, k*D+d_in, c_out]
    # bconv_ref: (L, 1, D)
    # wfcg_ref : (L, 2S, S)     [fc1 ; gate] weights stacked, NOT transposed
    # bfcg_ref : (L, 2S, 1)     [fc1 ; gate] biases stacked
    # woutT_ref: (D, C)         output Linear weight^T
    # bout_ref : (1, C)
    # out_ref  : (1, C)
    # xpad_ref : (S + 2*pad, D) VMEM scratch for zero-padded conv input
    S, D = x_ref.shape
    L, KD, _ = wconv_ref.shape
    K = KD // D
    pad = K // 2

    # Zero the scratch (only the pad rows really need it; the interior is
    # overwritten every layer).  Cheap: scratch is (S+2*pad, D) f32.
    xpad_ref[...] = jnp.zeros_like(xpad_ref)

    act = x_ref[...]                                            # (S, D) f32
    for l in range(L):                                          # static unroll over layers
        # current activation -> interior of the padded scratch
        xpad_ref[pl.ds(pad, S), :] = act
        # im2col slab (S, K*D): one MXU matmul instead of K small ones
        cols = jnp.concatenate(
            [xpad_ref[pl.ds(k, S), :] for k in range(K)], axis=1)
        y = jnp.maximum(
            jnp.dot(cols, wconv_ref[l], preferred_element_type=jnp.float32)
            + bconv_ref[l], 0.0)                                # relu(conv), (S, D)
        # Highway gate, staying in (S, D): left-multiply the stacked (2S, S)
        # weight (== PyTorch right-multiply in (D, S) layout) -> one matmul,
        # no transposes; split at the S=8 sublane-tile boundary.
        z = jnp.dot(wfcg_ref[l], y,
                    preferred_element_type=jnp.float32) + bfcg_ref[l]   # (2S, D)
        h = jnp.tanh(z[:S, :])                                  # fc1 half
        t = jax.nn.sigmoid(z[S:, :])                            # gate half
        act = t * h + (1.0 - t) * y                             # (S, D)

    # Head, fused: max over seq then Linear(D, C).
    pooled = jnp.max(act, axis=0, keepdims=True)                # (1, D)
    out_ref[...] = (jnp.dot(pooled, woutT_ref[...],
                            preferred_element_type=jnp.float32)
                    + bout_ref[...]).astype(out_ref.dtype)


# ------------------------------- wrapper -------------------------------------

def highway_cnn_forward(x, stacked, woutT, bout, K):
    """x: (B, S, D) embedded tokens -> (B, C) logits. One fused pallas_call."""
    wconv_flat, bconv, wfcg, bfcg = stacked
    B, S, D = x.shape
    L, KD, _ = wconv_flat.shape
    C = woutT.shape[1]
    pad = K // 2

    out = pl.pallas_call(
        fused_highway_kernel,
        out_shape=jax.ShapeDtypeStruct((B, 1, C), x.dtype),
        grid_spec=pltpu.PrefetchScalarGridSpec(
            num_scalar_prefetch=0,
            grid=(B,),
            in_specs=[
                pl.BlockSpec((None, S, D), lambda b: (b, 0, 0)),    # x[b]
                pl.BlockSpec((L, KD, D), lambda b: (0, 0, 0)),      # conv W (im2col)
                pl.BlockSpec((L, 1, D), lambda b: (0, 0, 0)),       # conv bias
                pl.BlockSpec((L, 2 * S, S), lambda b: (0, 0, 0)),   # [fc1; gate] W
                pl.BlockSpec((L, 2 * S, 1), lambda b: (0, 0, 0)),   # [fc1; gate] bias
                pl.BlockSpec((D, C), lambda b: (0, 0)),             # output W^T
                pl.BlockSpec((1, C), lambda b: (0, 0)),             # output bias
            ],
            out_specs=pl.BlockSpec((None, 1, C), lambda b: (b, 0, 0)),
            scratch_shapes=[pltpu.VMEM((S + 2 * pad, D), jnp.float32)],
        ),
        compiler_params=pltpu.CompilerParams(dimension_semantics=("parallel",)),
    )(x, wconv_flat, bconv, wfcg, bfcg, woutT, bout)
    return out.reshape(B, C)


# --------------------------- pure-JAX reference -------------------------------

def forward_ref(x, wconv_flat, bconv, wfc, bfc, wg, bg, woutT, bout, K):
    L = wconv_flat.shape[0]
    B, S, D = x.shape
    pad = K // 2
    act = x
    for l in range(L):
        xpad = jnp.pad(act, ((0, 0), (pad, pad), (0, 0)))
        cols = jnp.concatenate([xpad[:, k:k + S, :] for k in range(K)], axis=-1)
        y = jnp.maximum(jnp.einsum('bsk,kc->bsc', cols, wconv_flat[l]) + bconv[l], 0.0)
        h = jnp.tanh(jnp.einsum('ts,bsd->btd', wfc[l], y) + bfc[l])
        t = jax.nn.sigmoid(jnp.einsum('ts,bsd->btd', wg[l], y) + bg[l])
        act = t * h + (1.0 - t) * y
    pooled = jnp.max(act, axis=1)
    return pooled @ woutT + bout


# ---------------------------------- main --------------------------------------

if __name__ == "__main__":
    # embed_num V=50, embed_dim D=32, class_num C=4, kernel_sizes=[3],
    # layer_num_highway=2, batch B=2, seq len S=8.
    B, S, D, V, C, K, N_LAYERS = 2, 8, 32, 50, 4, 3, 2

    key = jax.random.PRNGKey(0)
    k_tok, k_emb, k_par = jax.random.split(key, 3)

    x_tokens = jax.random.randint(k_tok, (B, S), 0, V, dtype=jnp.int32)
    embed_table = jax.random.normal(k_emb, (V, D), jnp.float32) * 0.1

    # Deterministic parameter init (PyTorch-style uniform(-1/sqrt(fan_in), .)).
    wconv_l, bconv_l, wfc_l, bfc_l, wg_l, bg_l = [], [], [], [], [], []
    pk = k_par
    for _ in range(N_LAYERS):
        pk, kc, kcb, kf, kfb, kg, kgb = jax.random.split(pk, 7)
        cb = 1.0 / (K * D) ** 0.5
        lb = 1.0 / S ** 0.5
        wconv_l.append(jax.random.uniform(kc, (K, D, D), jnp.float32, -cb, cb))  # [k, d_in, c_out]
        bconv_l.append(jax.random.uniform(kcb, (1, D), jnp.float32, -cb, cb))
        wfc_l.append(jax.random.uniform(kf, (S, S), jnp.float32, -lb, lb))       # [s_out, s_in]
        bfc_l.append(jax.random.uniform(kfb, (S, 1), jnp.float32, -lb, lb))
        wg_l.append(jax.random.uniform(kg, (S, S), jnp.float32, -lb, lb))
        bg_l.append(jax.random.uniform(kgb, (S, 1), jnp.float32, -lb, lb))
    pk, ko, kob = jax.random.split(pk, 3)
    ob = 1.0 / D ** 0.5
    woutT = jax.random.uniform(ko, (D, C), jnp.float32, -ob, ob)                 # output Linear W^T
    bout = jax.random.uniform(kob, (1, C), jnp.float32, -ob, ob)

    # Stack per-layer params so the single fused kernel sees them all.
    wconv_flat = jnp.stack([w.reshape(K * D, D) for w in wconv_l])   # (L, K*D, D)
    bconv = jnp.stack(bconv_l)                                       # (L, 1, D)
    wfc = jnp.stack(wfc_l)                                           # (L, S, S)
    bfc = jnp.stack(bfc_l)                                           # (L, S, 1)
    wg = jnp.stack(wg_l)                                             # (L, S, S)
    bg = jnp.stack(bg_l)                                             # (L, S, 1)
    # Fused fc1 + gate: one (2S, S) left-multiply per layer in the kernel.
    wfcg = jnp.concatenate([wfc, wg], axis=1)                        # (L, 2S, S)
    bfcg = jnp.concatenate([bfc, bg], axis=1)                        # (L, 2S, 1)

    stacked = (wconv_flat, bconv, wfcg, bfcg)

    # Embedding lookup (gather) stays in plain JAX glue.
    x = embed_table[x_tokens]                                # (B, S, D)

    out = highway_cnn_forward(x, stacked, woutT, bout, K)    # (B, C)
    out = jax.block_until_ready(out)

    out_ref = forward_ref(x, wconv_flat, bconv, wfc, bfc, wg, bg, woutT, bout, K)
    assert out.shape == (B, C)
    assert bool(jnp.allclose(out, out_ref, rtol=1e-4, atol=1e-4)), "mismatch vs JAX reference"

    print("KERNEL_OK")
</pallas_src>

<mosaic_0001>
module attributes {stable_mosaic.version = 11 : i64} {
  func.func @fused_highway_kernel(%arg0: i32, %arg1: memref<1x8x32xf32, #tpu.memory_space<vmem>>, %arg2: memref<2x96x32xf32, #tpu.memory_space<vmem>>, %arg3: memref<2x1x32xf32, #tpu.memory_space<vmem>>, %arg4: memref<2x16x8xf32, #tpu.memory_space<vmem>>, %arg5: memref<2x16x1xf32, #tpu.memory_space<vmem>>, %arg6: memref<32x4xf32, #tpu.memory_space<vmem>>, %arg7: memref<1x4xf32, #tpu.memory_space<vmem>>, %arg8: memref<1x1x4xf32, #tpu.memory_space<vmem>>, %arg9: memref<10x32xf32, #tpu.memory_space<vmem>>) attributes {dimension_semantics = [#tpu.dimension_semantics<parallel>], iteration_bounds = array<i64: 2>, scalar_prefetch = 0 : i64, scratch_operands = 1 : i64, tpu.core_type = #tpu.core_type<tc>, window_params = [{transform_indices = @transform_0, window_bounds = array<i64: 1, 8, 32>}, {pipeline_mode = #tpu.pipeline_mode<synchronous>, transform_indices = @transform_1, window_bounds = array<i64: 2, 96, 32>}, {pipeline_mode = #tpu.pipeline_mode<synchronous>, transform_indices = @transform_2, window_bounds = array<i64: 2, 1, 32>}, {pipeline_mode = #tpu.pipeline_mode<synchronous>, transform_indices = @transform_3, window_bounds = array<i64: 2, 16, 8>}, {pipeline_mode = #tpu.pipeline_mode<synchronous>, transform_indices = @transform_4, window_bounds = array<i64: 2, 16, 1>}, {pipeline_mode = #tpu.pipeline_mode<synchronous>, transform_indices = @transform_5, window_bounds = array<i64: 32, 4>}, {pipeline_mode = #tpu.pipeline_mode<synchronous>, transform_indices = @transform_6, window_bounds = array<i64: 1, 4>}, {transform_indices = @transform_7, window_bounds = array<i64: 1, 1, 4>}]} {
    %cst = arith.constant 0.000000e+00 : f32
    %0 = vector.broadcast %cst : f32 to vector<10x32xf32>
    %c0 = arith.constant 0 : index
    %c0_0 = arith.constant 0 : index
    %1 = vector.load %arg9[%c0, %c0_0] : memref<10x32xf32, #tpu.memory_space<vmem>>, vector<10x32xf32>
    tpu.vector_store %arg9[%c0, %c0_0], %0 {strides = array<i32>} : memref<10x32xf32, #tpu.memory_space<vmem>>, vector<10x32xf32>,
    %c0_1 = arith.constant 0 : index
    %c0_2 = arith.constant 0 : index
    %c0_3 = arith.constant 0 : index
    %2 = vector.load %arg1[%c0_1, %c0_2, %c0_3] : memref<1x8x32xf32, #tpu.memory_space<vmem>>, vector<1x8x32xf32>
    %3 = vector.shape_cast %2 : vector<1x8x32xf32> to vector<8x32xf32>
    %c1 = arith.constant 1 : index
    %c0_4 = arith.constant 0 : index
    %4 = vector.load %arg9[%c1, %c0_4] : memref<10x32xf32, #tpu.memory_space<vmem>>, vector<8x32xf32>
    tpu.vector_store %arg9[%c1, %c0_4], %3 {strides = array<i32>} : memref<10x32xf32, #tpu.memory_space<vmem>>, vector<8x32xf32>,
    %c0_5 = arith.constant 0 : index
    %c0_6 = arith.constant 0 : index
    %5 = vector.load %arg9[%c0_5, %c0_6] : memref<10x32xf32, #tpu.memory_space<vmem>>, vector<8x32xf32>
    %c1_7 = arith.constant 1 : index
    %c0_8 = arith.constant 0 : index
    %6 = vector.load %arg9[%c1_7, %c0_8] : memref<10x32xf32, #tpu.memory_space<vmem>>, vector<8x32xf32>
    %c2 = arith.constant 2 : index
    %c0_9 = arith.constant 0 : index
    %7 = vector.load %arg9[%c2, %c0_9] : memref<10x32xf32, #tpu.memory_space<vmem>>, vector<8x32xf32>
    %8 = tpu.concatenate %5, %6, %7 in 1 : vector<8x32xf32>, vector<8x32xf32>, vector<8x32xf32> -> vector<8x96xf32>
    %c0_10 = arith.constant 0 : index
    %c0_11 = arith.constant 0 : index
    %c0_12 = arith.constant 0 : index
    %9 = vector.load %arg2[%c0_10, %c0_11, %c0_12] : memref<2x96x32xf32, #tpu.memory_space<vmem>>, vector<1x96x32xf32>
    %10 = vector.shape_cast %9 : vector<1x96x32xf32> to vector<96x32xf32>
    %cst_13 = arith.constant dense<0.000000e+00> : vector<8x32xf32>
    %11 = tpu.matmul %8, %10, %cst_13 {dimension_numbers = #tpu.dot_dimension_numbers<[1], [0], [0], [1], [0, 0, 1, 1], [], []>} : vector<8x96xf32>, vector<96x32xf32>, vector<8x32xf32> -> vector<8x32xf32>
    %c0_14 = arith.constant 0 : index
    %c0_15 = arith.constant 0 : index
    %c0_16 = arith.constant 0 : index
    %12 = vector.load %arg3[%c0_14, %c0_15, %c0_16] : memref<2x1x32xf32, #tpu.memory_space<vmem>>, vector<1x1x32xf32>
    %13 = vector.shape_cast %12 : vector<1x1x32xf32> to vector<1x32xf32>
    %14 = vector.broadcast %13 : vector<1x32xf32> to vector<8x32xf32>
    %15 = arith.addf %11, %14 : vector<8x32xf32>
    %cst_17 = arith.constant 0.000000e+00 : f32
    %16 = vector.broadcast %cst_17 : f32 to vector<8x32xf32>
    %17 = arith.maximumf %15, %16 : vector<8x32xf32>
    %c0_18 = arith.constant 0 : index
    %c0_19 = arith.constant 0 : index
    %c0_20 = arith.constant 0 : index
    %18 = vector.load %arg4[%c0_18, %c0_19, %c0_20] : memref<2x16x8xf32, #tpu.memory_space<vmem>>, vector<1x16x8xf32>
    %19 = vector.shape_cast %18 : vector<1x16x8xf32> to vector<16x8xf32>
    %cst_21 = arith.constant dense<0.000000e+00> : vector<16x32xf32>
    %20 = tpu.matmul %19, %17, %cst_21 {dimension_numbers = #tpu.dot_dimension_numbers<[1], [0], [0], [1], [0, 0, 1, 1], [], []>} : vector<16x8xf32>, vector<8x32xf32>, vector<16x32xf32> -> vector<16x32xf32>
    %c0_22 = arith.constant 0 : index
    %c0_23 = arith.constant 0 : index
    %c0_24 = arith.constant 0 : index
    %21 = vector.load %arg5[%c0_22, %c0_23, %c0_24] : memref<2x16x1xf32, #tpu.memory_space<vmem>>, vector<1x16x1xf32>
    %22 = vector.shape_cast %21 : vector<1x16x1xf32> to vector<16x1xf32>
    %23 = vector.broadcast %22 : vector<16x1xf32> to vector<16x32xf32>
    %24 = arith.addf %20, %23 : vector<16x32xf32>
    %25 = vector.extract_strided_slice %24 {offsets = [0, 0], sizes = [8, 32], strides = [1, 1]} : vector<16x32xf32> to vector<8x32xf32>
    %26 = math.tanh %25 : vector<8x32xf32>
    %27 = vector.extract_strided_slice %24 {offsets = [8, 0], sizes = [8, 32], strides = [1, 1]} : vector<16x32xf32> to vector<8x32xf32>
    %28 = arith.negf %27 : vector<8x32xf32>
    %29 = math.exp %28 : vector<8x32xf32>
    %cst_25 = arith.constant 1.000000e+00 : f32
    %30 = vector.broadcast %cst_25 : f32 to vector<8x32xf32>
    %31 = arith.addf %30, %29 : vector<8x32xf32>
    %32 = arith.divf %30, %31 : vector<8x32xf32>
    %33 = arith.mulf %32, %26 : vector<8x32xf32>
    %cst_26 = arith.constant 1.000000e+00 : f32
    %34 = vector.broadcast %cst_26 : f32 to vector<8x32xf32>
    %35 = arith.subf %34, %32 : vector<8x32xf32>
    %36 = arith.mulf %35, %17 : vector<8x32xf32>
    %37 = arith.addf %33, %36 : vector<8x32xf32>
    %c1_27 = arith.constant 1 : index
    %c0_28 = arith.constant 0 : index
    %38 = vector.load %arg9[%c1_27, %c0_28] : memref<10x32xf32, #tpu.memory_space<vmem>>, vector<8x32xf32>
    tpu.vector_store %arg9[%c1_27, %c0_28], %37 {strides = array<i32>} : memref<10x32xf32, #tpu.memory_space<vmem>>, vector<8x32xf32>,
    %c0_29 = arith.constant 0 : index
    %c0_30 = arith.constant 0 : index
    %39 = vector.load %arg9[%c0_29, %c0_30] : memref<10x32xf32, #tpu.memory_space<vmem>>, vector<8x32xf32>
    %c1_31 = arith.constant 1 : index
    %c0_32 = arith.constant 0 : index
    %40 = vector.load %arg9[%c1_31, %c0_32] : memref<10x32xf32, #tpu.memory_space<vmem>>, vector<8x32xf32>
    %c2_33 = arith.constant 2 : index
    %c0_34 = arith.constant 0 : index
    %41 = vector.load %arg9[%c2_33, %c0_34] : memref<10x32xf32, #tpu.memory_space<vmem>>, vector<8x32xf32>
    %42 = tpu.concatenate %39, %40, %41 in 1 : vector<8x32xf32>, vector<8x32xf32>, vector<8x32xf32> -> vector<8x96xf32>
    %c1_35 = arith.constant 1 : index
    %c0_36 = arith.constant 0 : index
    %c0_37 = arith.constant 0 : index
    %43 = vector.load %arg2[%c1_35, %c0_36, %c0_37] : memref<2x96x32xf32, #tpu.memory_space<vmem>>, vector<1x96x32xf32>
    %44 = vector.shape_cast %43 : vector<1x96x32xf32> to vector<96x32xf32>
    %cst_38 = arith.constant dense<0.000000e+00> : vector<8x32xf32>
    %45 = tpu.matmul %42, %44, %cst_38 {dimension_numbers = #tpu.dot_dimension_numbers<[1], [0], [0], [1], [0, 0, 1, 1], [], []>} : vector<8x96xf32>, vector<96x32xf32>, vector<8x32xf32> -> vector<8x32xf32>
    %c1_39 = arith.constant 1 : index
    %c0_40 = arith.constant 0 : index
    %c0_41 = arith.constant 0 : index
    %46 = vector.load %arg3[%c1_39, %c0_40, %c0_41] : memref<2x1x32xf32, #tpu.memory_space<vmem>>, vector<1x1x32xf32>
    %47 = vector.shape_cast %46 : vector<1x1x32xf32> to vector<1x32xf32>
    %48 = vector.broadcast %47 : vector<1x32xf32> to vector<8x32xf32>
    %49 = arith.addf %45, %48 : vector<8x32xf32>
    %cst_42 = arith.constant 0.000000e+00 : f32
    %50 = vector.broadcast %cst_42 : f32 to vector<8x32xf32>
    %51 = arith.maximumf %49, %50 : vector<8x32xf32>
    %c1_43 = arith.constant 1 : index
    %c0_44 = arith.constant 0 : index
    %c0_45 = arith.constant 0 : index
    %52 = vector.load %arg4[%c1_43, %c0_44, %c0_45] : memref<2x16x8xf32, #tpu.memory_space<vmem>>, vector<1x16x8xf32>
    %53 = vector.shape_cast %52 : vector<1x16x8xf32> to vector<16x8xf32>
    %cst_46 = arith.constant dense<0.000000e+00> : vector<16x32xf32>
    %54 = tpu.matmul %53, %51, %cst_46 {dimension_numbers = #tpu.dot_dimension_numbers<[1], [0], [0], [1], [0, 0, 1, 1], [], []>} : vector<16x8xf32>, vector<8x32xf32>, vector<16x32xf32> -> vector<16x32xf32>
    %c1_47 = arith.constant 1 : index
    %c0_48 = arith.constant 0 : index
    %c0_49 = arith.constant 0 : index
    %55 = vector.load %arg5[%c1_47, %c0_48, %c0_49] : memref<2x16x1xf32, #tpu.memory_space<vmem>>, vector<1x16x1xf32>
    %56 = vector.shape_cast %55 : vector<1x16x1xf32> to vector<16x1xf32>
    %57 = vector.broadcast %56 : vector<16x1xf32> to vector<16x32xf32>
    %58 = arith.addf %54, %57 : vector<16x32xf32>
    %59 = vector.extract_strided_slice %58 {offsets = [0, 0], sizes = [8, 32], strides = [1, 1]} : vector<16x32xf32> to vector<8x32xf32>
    %60 = math.tanh %59 : vector<8x32xf32>
    %61 = vector.extract_strided_slice %58 {offsets = [8, 0], sizes = [8, 32], strides = [1, 1]} : vector<16x32xf32> to vector<8x32xf32>
    %62 = arith.negf %61 : vector<8x32xf32>
    %63 = math.exp %62 : vector<8x32xf32>
    %cst_50 = arith.constant 1.000000e+00 : f32
    %64 = vector.broadcast %cst_50 : f32 to vector<8x32xf32>
    %65 = arith.addf %64, %63 : vector<8x32xf32>
    %66 = arith.divf %64, %65 : vector<8x32xf32>
    %67 = arith.mulf %66, %60 : vector<8x32xf32>
    %cst_51 = arith.constant 1.000000e+00 : f32
    %68 = vector.broadcast %cst_51 : f32 to vector<8x32xf32>
    %69 = arith.subf %68, %66 : vector<8x32xf32>
    %70 = arith.mulf %69, %51 : vector<8x32xf32>
    %71 = arith.addf %67, %70 : vector<8x32xf32>
    %cst_52 = arith.constant dense<0xFF800000> : vector<32xf32>
    %72 = vector.multi_reduction <maximumf>, %71, %cst_52 [0] : vector<8x32xf32> to vector<32xf32>
    %73 = vector.shape_cast %72 : vector<32xf32> to vector<1x32xf32>
    %c0_53 = arith.constant 0 : index
    %c0_54 = arith.constant 0 : index
    %74 = vector.load %arg6[%c0_53, %c0_54] : memref<32x4xf32, #tpu.memory_space<vmem>>, vector<32x4xf32>
    %cst_55 = arith.constant dense<0.000000e+00> : vector<1x4xf32>
    %75 = tpu.matmul %73, %74, %cst_55 {dimension_numbers = #tpu.dot_dimension_numbers<[1], [0], [0], [1], [0, 0, 1, 1], [], []>} : vector<1x32xf32>, vector<32x4xf32>, vector<1x4xf32> -> vector<1x4xf32>
    %c0_56 = arith.constant 0 : index
    %c0_57 = arith.constant 0 : index
    %76 = vector.load %arg7[%c0_56, %c0_57] : memref<1x4xf32, #tpu.memory_space<vmem>>, vector<1x4xf32>
    %77 = arith.addf %75, %76 : vector<1x4xf32>
    %c0_58 = arith.constant 0 : index
    %c0_59 = arith.constant 0 : index
    %c0_60 = arith.constant 0 : index
    %78 = vector.load %arg8[%c0_58, %c0_59, %c0_60] : memref<1x1x4xf32, #tpu.memory_space<vmem>>, vector<1x1x4xf32>
    %79 = vector.shape_cast %78 : vector<1x1x4xf32> to vector<1x4xf32>
    %80 = vector.shape_cast %77 : vector<1x4xf32> to vector<1x1x4xf32>
    tpu.vector_store %arg8[%c0_58, %c0_59, %c0_60], %80 {strides = array<i32>} : memref<1x1x4xf32, #tpu.memory_space<vmem>>, vector<1x1x4xf32>,
    return
  }
  func.func @transform_0(%arg0: i32) -> (i32, i32, i32) {
    %c0_i32 = arith.constant 0 : i32
    %c0_i32_0 = arith.constant 0 : i32
    %c0_i32_1 = arith.constant 0 : i32
    return %arg0, %c0_i32, %c0_i32_0 : i32, i32, i32
  }
  func.func @transform_1(%arg0: i32) -> (i32, i32, i32) {
    %c0_i32 = arith.constant 0 : i32
    %c0_i32_0 = arith.constant 0 : i32
    %c0_i32_1 = arith.constant 0 : i32
    %c0_i32_2 = arith.constant 0 : i32
    return %c0_i32, %c0_i32_0, %c0_i32_1 : i32, i32, i32
  }
  func.func @transform_2(%arg0: i32) -> (i32, i32, i32) {
    %c0_i32 = arith.constant 0 : i32
    %c0_i32_0 = arith.constant 0 : i32
    %c0_i32_1 = arith.constant 0 : i32
    %c0_i32_2 = arith.constant 0 : i32
    return %c0_i32, %c0_i32_0, %c0_i32_1 : i32, i32, i32
  }
  func.func @transform_3(%arg0: i32) -> (i32, i32, i32) {
    %c0_i32 = arith.constant 0 : i32
    %c0_i32_0 = arith.constant 0 : i32
    %c0_i32_1 = arith.constant 0 : i32
    %c0_i32_2 = arith.constant 0 : i32
    return %c0_i32, %c0_i32_0, %c0_i32_1 : i32, i32, i32
  }
  func.func @transform_4(%arg0: i32) -> (i32, i32, i32) {
    %c0_i32 = arith.constant 0 : i32
    %c0_i32_0 = arith.constant 0 : i32
    %c0_i32_1 = arith.constant 0 : i32
    %c0_i32_2 = arith.constant 0 : i32
    return %c0_i32, %c0_i32_0, %c0_i32_1 : i32, i32, i32
  }
  func.func @transform_5(%arg0: i32) -> (i32, i32) {
    %c0_i32 = arith.constant 0 : i32
    %c0_i32_0 = arith.constant 0 : i32
    %c0_i32_1 = arith.constant 0 : i32
    return %c0_i32, %c0_i32_0 : i32, i32
  }
  func.func @transform_6(%arg0: i32) -> (i32, i32) {
    %c0_i32 = arith.constant 0 : i32
    %c0_i32_0 = arith.constant 0 : i32
    %c0_i32_1 = arith.constant 0 : i32
    return %c0_i32, %c0_i32_0 : i32, i32
  }
  func.func @transform_7(%arg0: i32) -> (i32, i32, i32) {
    %c0_i32 = arith.constant 0 : i32
    %c0_i32_0 = arith.constant 0 : i32
    %c0_i32_1 = arith.constant 0 : i32
    return %arg0, %c0_i32, %c0_i32_0 : i32, i32, i32
  }
}

</mosaic_0001>

<bundles_post_ra>
// kernel: tpu_custom_call.1
= control target key start
LH: loop header
LB: loop body
LE: loop exit
PB: predicated region body
PF: predicated region fallthrough
CT: control target
= control target key end

     0   :  { %12 = vsyncpa [#allocation4], 0  ;;  %s1445_s0 = inlined_call_operand.vmem [shape: f32[2,8,32], index: 0, kind: input, shape index: {}]   ;;  %s1446_s1 = inlined_call_operand.vmem [shape: f32[2,96,32], index: 1, kind: input, shape index: {}]   ;;  %s1447_s2 = inlined_call_operand.vmem [shape: f32[2,1,32], index: 2, kind: input, shape index: {}]   ;;  %s1448_s3 = inlined_call_operand.vmem [shape: f32[2,16,8], index: 3, kind: input, shape index: {}]   ;;  %s1449_s4 = inlined_call_operand.vmem [shape: f32[2,16,1], index: 4, kind: input, shape index: {}]   ;;  %s1450_s5 = inlined_call_operand.vmem [shape: f32[32,4], index: 5, kind: input, shape index: {}]   ;;  %s1451_s6 = inlined_call_operand.vmem [shape: f32[1,4], index: 6, kind: input, shape index: {}]   ;;  %s1452_s7 = inlined_call_operand.hbm [shape: f32[2,1,4], index: 7, kind: output, shape index: {}]  }
   0x1   :  { %14 = vsyncpa [#allocation4 + $0x1], 0  ;;  %s1180_s24 = smov 0   ;;  %s1182_s25 = smov 0  }
   0x2   :  { %s1184_s26 = smov 0   ;;  %s1186_s27 = smov 0  }
   0x3 LB: > { %s1201_s28 = sadd.s32 4294967295, %s1132_s27   ;;  %s866_s29 = sadd.s32 4294967294, %s1132_s27   ;;  %s1132_s27 = sphi %s1186_s27, %s1458_s27   ;;  %s1128_s26 = sphi %s1184_s26, %s1457_s26   ;;  %s1124_s25 = sphi %s1182_s25, %s1456_s25   ;;  %s1120_s24 = sphi %s1180_s24, %s1455_s24  }
   0x4   : > { %s1205_s30 = sadd.s32 1, %s1132_s27   ;;  %s179_s8 = sadd.s32 1, %s1128_s26 }
   0x5   : > { %s176_s9 = ssub.s32 %s1132_s27, %s1205_s30  ;;  %p189_p0 = scmp.ne.s32.totalorder %s1128_s26, %s1124_s25 }
   0x6   : > { %p177_p1 = scmp.eq.s32.totalorder %s176_s9, 0  ;;  %p190_p2 = scmp.eq.s32.totalorder %s1201_s28, 1 }
   0x7   : > { %p195_p3 = scmp.ne.s32.totalorder %s1124_s25, %s1120_s24  ;;  %p196_p4 = scmp.eq.s32.totalorder %s866_s29, 1 }
   0x8   : > { %s1216_s10 = scalar_select %p177_p1, %s1128_s26, %s179_s8  }
   0x9   : > { %p1218_p5 = por %p190_p2, %p189_p0  ;;  %p1222_p6 = por %p196_p4, %p195_p3 }
   0xa   : > { %p869_p7 = scmp.ge.s32.totalorder %s1132_s27, 1  ;;  %p239_p8 = scmp.lt.s32.totalorder %s1132_s27, 3 }
   0xc   : > { %p240_p9 = pnand %p869_p7, %p239_p8 }
   0xd   : > { %p269_p10 = scmp.lt.s32.totalorder (!%p240_p9), %s1201_s28, 1  ;;  %s1137_s8 = smov (!%p240_p9), 64  }
   0xe   : > { %243 = sbr.rel (%p240_p9) target bundleno = 1363 (0x553), region = 48  ;;  %s899_s19 = sshll.u32 (!%p240_p9), %s1201_s28, 4 }
   0xf   : > { %s1410_s9 = scalar_lea.hbm (!%p240_p9), %s1452_s7, %s899_s19 }
  0x13   : > { %vm273_vm0 = vcmask 261120   ;;  %vm275_vm1 = vcmask 254976   ;;  %v304_v0 = vld [vmem:[%s1446_s1 + $0x58] sm:$0xff]  ;;  %v1134_v1 = vmov 0.0   ;;  %v303_v2 = vld [vmem:[%s1446_s1 + $0x50] sm:$0xff]  ;;  %s270_s17 = scalar_select %p269_p10, %s1201_s28, 1 }
  0x14   : > { %274 = vst.msk [vmem:[#allocation2] sm:$0xff] %vm273_vm0, %v1134_v1  ;;  %939 = vmatprep.subr.mxu0 %v1134_v1  ;;  %971 = vmatprep.subr.mxu1 %v1134_v1  ;;  %v302_v3 = vld [vmem:[%s1446_s1 + $0x48] sm:$0xff]  ;;  %v301_v4 = vld [vmem:[%s1446_s1 + $0x40] sm:$0xff]  ;;  %vm1135_vm2 = vmmov 0   ;;  %v300_v6 = vld [vmem:[%s1446_s1 + $0x38] sm:$0xff]  ;;  %vm291_vm3 = vcmask 523264  }
  0x15   : > { %276 = vst.msk [vmem:[#allocation2 + $0x8] sm:$0x3] %vm275_vm1, %v1134_v1  ;;  %940 = vmatpush3.msra.mxu0 %v304_v0  ;;  %s870_s20 = sshll.u32 %s270_s17, 3  ;;  %963 = vmatprep.mubr.msk.f32.mxu0 %vm1135_vm2, %v1134_v1  ;;  %v299_v7 = vld [vmem:[%s1446_s1 + $0x30] sm:$0xff]  ;;  %v298_v8 = vld [vmem:[%s1446_s1 + $0x28] sm:$0xff]  ;;  %v297_v9 = vld [vmem:[%s1446_s1 + $0x20] sm:$0xff] }
  0x16   : > { %941 = vmatprep.subr.mxu0 %v1134_v1  ;;  %s272_s23 = scalar_lea.vmem %s1445_s0, %s870_s20  ;;  %995 = vmatprep.mubr.msk.f32.mxu1 %vm1135_vm2, %v1134_v1  ;;  %s1136_s20 = smov 32   ;;  %v296_v11 = vld [vmem:[%s1446_s1 + $0x18] sm:$0xff]  ;;  %v295_v13 = vld [vmem:[%s1446_s1 + $0x10] sm:$0xff]  ;;  %v294_v14 = vld [vmem:[%s1446_s1 + $0x8] sm:$0xff]  ;;  %vm312_vm4 = vcmask 785408   ;;  %vm401_vm5 = vcmask 64512  }
  0x17   : > { %942 = vmatpush3.msra.mxu0 %v303_v2  ;;  %v277_v5 = vld [vmem:[%s272_s23] sm:$0xff]  ;;  %v390_v22 = vld [vmem:[%s1449_s4 + $0x8] sm:$0xff]  ;;  %v1138_v23 = vmov 0   ;;  %v887_v31 = vld [vmem:[%s1446_s1 + $0xb8] sm:$0xff]  ;;  %vm796_vm6 = vcmask 24576   ;;  %s1139_s28 = smov [#allocation3]  }
  0x18   : > { %943 = vmatprep.subr.mxu0 %v1134_v1  ;;  %278 = vst.msk [vmem:[#allocation2 + $0x1] sm:$0xff] %vm273_vm0, %v277_v5  ;;  %v293_v15 = vld [vmem:[%s1446_s1] sm:$0xff]  ;;  %1058 = vset.pattern.permute.xlu1 %v1138_v23  ;;  %v388_v30 = vld [vmem:[%s1448_s3 + $0x8] sm:$0xff]  ;;  %v886_v32 = vld [vmem:[%s1446_s1 + $0xb0] sm:$0xff]  ;;  %s1076_s15 = sshll.u32 %s1139_s28, 4  ;;  %s1077_s15 = int_to_ptr.vmem [resolvable:$false] %s1076_s15 }
  0x19   : > { %944 = vmatpush3.msra.mxu0 %v302_v3  ;;  %v387_v21 = vld [vmem:[%s1448_s3] sm:$0xff]  ;;  %1059 = vset.pattern.permute.xlu0 %v1138_v23  ;;  %v885_v33 = vld [vmem:[%s1446_s1 + $0xa8] sm:$0xff]  ;;  %v883_v35 = vld [vmem:[%s1446_s1 + $0x98] sm:$0xff] }
  0x1a   : > { %945 = vmatprep.subr.mxu0 %v1134_v1  ;;  %398 = vperm.xlu1 %1058, %v390_v22   ;;  %v389_v24 = vld [vmem:[%s1449_s4] sm:$0xff]  ;;  %v882_v36 = vld [vmem:[%s1446_s1 + $0x90] sm:$0xff]  ;;  %v881_v37 = vld [vmem:[%s1446_s1 + $0x88] sm:$0xff] }
  0x1b   : > { %946 = vmatpush3.msra.mxu0 %v301_v4  ;;  %v871_v25 = vld [vmem:[%s1447_s2] ss:$0 sm:$0xff]  ;;  %972 = vmatpush3.msra.mxu1 %v887_v31  ;;  %v879_v39 = vld [vmem:[%s1446_s1 + $0x78] sm:$0xff]  ;;  %v878_v40 = vld [vmem:[%s1446_s1 + $0x70] sm:$0xff] }
  0x1c   : > { %947 = vmatprep.subr.mxu0 %v1134_v1  ;;  %973 = vmatprep.subr.mxu1 %v1134_v1  ;;  %v884_v34 = vld [vmem:[%s1446_s1 + $0xa0] sm:$0xff]  ;;  %v877_v41 = vld [vmem:[%s1446_s1 + $0x68] sm:$0xff]  ;;  %v893_v60 = vld [vmem:[%s1449_s4 + $0x10] sm:$0xff] }
  0x1d   : > { %948 = vmatpush3.msra.mxu0 %v300_v6  ;;  %974 = vmatpush3.msra.mxu1 %v886_v32  ;;  %v880_v38 = vld [vmem:[%s1446_s1 + $0x80] sm:$0xff]  ;;  %v891_v3 = vld [vmem:[%s1448_s3 + $0x10] sm:$0xff]  ;;  %v894_v4 = vld [vmem:[%s1449_s4 + $0x18] sm:$0xff] }
  0x1e   : > { %949 = vmatprep.subr.mxu0 %v1134_v1  ;;  %393 = vperm.xlu1 %1058, %v389_v24   ;;  %v876_v54 = vld [vmem:[%s1446_s1 + $0x60] sm:$0xff] }
  0x1f   : > { %950 = vmatpush3.msra.mxu0 %v299_v7  ;;  %v280_v10 = vld [vmem:[#allocation2 + $0x1] sm:$0xff]  ;;  %975 = vmatprep.subr.mxu1 %v1134_v1 }
  0x20   : > { %951 = vmatprep.subr.mxu0 %v1134_v1  ;;  %283 = vrot.lane.b32.xlu0 %v280_v10, %s1136_s20  ;;  %v281_v12 = vld [vmem:[#allocation2 + $0x2] sm:$0xff]  ;;  %v889_v5 = vld [vmem:[%s1447_s2 + $0x1] ss:$0 sm:$0xff]  ;;  %v892_v10 = vld [vmem:[%s1448_s3 + $0x18] sm:$0xff] }
  0x21   : > { %952 = vmatpush3.msra.mxu0 %v298_v8  ;;  %v279_v17 = vld [vmem:[#allocation2] sm:$0xff]  ;;  %976 = vmatpush3.msra.mxu1 %v885_v33 }
  0x22   : > { %953 = vmatprep.subr.mxu0 %v1134_v1  ;;  %977 = vmatprep.subr.mxu1 %v1134_v1 }
  0x23   : > { %954 = vmatpush3.msra.mxu0 %v297_v9  ;;  %978 = vmatpush3.msra.mxu1 %v884_v34 }
  0x24   : > { %955 = vmatprep.subr.mxu0 %v1134_v1  ;;  %287 = vrot.lane.b32.xlu0 %v281_v12, %s1137_s8  ;;  %v720_v12 = vld [vmem:[%s1450_s5 + $0x10] sm:$0xff] }
  0x25   : > { %956 = vmatpush3.msra.mxu0 %v296_v11  ;;  %979 = vmatprep.subr.mxu1 %v1134_v1  ;;  %v721_v11 = vld [vmem:[%s1450_s5 + $0x18] sm:$0xff] }
  0x26   : > { %957 = vmatprep.subr.mxu0 %v1134_v1  ;;  %980 = vmatpush3.msra.mxu1 %v883_v35 }
  0x27   : > { %958 = vmatpush3.msra.mxu0 %v295_v13  ;;  %981 = vmatprep.subr.mxu1 %v1134_v1  ;;  %v719_v13 = vld [vmem:[%s1450_s5 + $0x8] sm:$0xff] }
  0x28   : > { %959 = vmatprep.subr.mxu0 %v1134_v1  ;;  %982 = vmatpush3.msra.mxu1 %v882_v36  ;;  %v722_v36 = vld [vmem:[%s1451_s6] sm:$0x1] }
  0x29   : > { %960 = vmatpush3.msra.mxu0 %v294_v14  ;;  %983 = vmatprep.subr.mxu1 %v1134_v1  ;;  %v718_v14 = vld [vmem:[%s1450_s5] sm:$0xff] }
  0x2a   : > { %961 = vmatprep.subr.mxu0 %v1134_v1  ;;  %984 = vmatpush3.msra.mxu1 %v881_v37 }
  0x2b   : > { %962 = vmatpush3.msra.mxu0 %v293_v15  ;;  %985 = vmatprep.subr.mxu1 %v1134_v1 }
  0x2c   : > { %986 = vmatpush3.msra.mxu1 %v880_v38 }
  0x2d   : > { %987 = vmatprep.subr.mxu1 %v1134_v1 }
  0x2e   : > { %988 = vmatpush3.msra.mxu1 %v879_v39 }
  0x2f   : > { %989 = vmatprep.subr.mxu1 %v1134_v1 }
  0x30   : > { %990 = vmatpush3.msra.mxu1 %v878_v40 }
  0x31   : > { %991 = vmatprep.subr.mxu1 %v1134_v1 }
  0x32   : > { %992 = vmatpush3.msra.mxu1 %v877_v41 }
  0x33   : > { %993 = vmatprep.subr.mxu1 %v1134_v1 }
  0x34   : > { %994 = vmatpush3.msra.mxu1 %v876_v54 }
  0x35   : > { %1003 = vmatprep.subr.mxu1 %v1134_v1 }
  0x92   : > { %v284_v16 = vpop.permute.xlu0 %283 }
  0x93   : > { %v290_v18 = vsel %vm273_vm0, %v279_v17, %v284_v16 }
  0x95   : > { %v399_v42 = vpop.permute.xlu1 %398 }
  0x96   : > { %v288_v19 = vpop.permute.xlu0 %287 }
  0x97   : > { %v292_v20 = vsel %vm291_vm3, %v290_v18, %v288_v19 }
  0x98   : > { %964 = vmatmul.mubr.msk.f32.vlgmr.msra.gmra.mxu0 %vm312_vm4, %v292_v20 }
  0x99   : > { %968 = vmatprep.mubr.msk.f32.mxu0 %vm401_vm5, %v387_v21  ;;  %v394_v48 = vpop.permute.xlu1 %393 }
 0x158   : > { %v382_v26 = vpop.f32.mrf.mxu0 }
 0x159   : > { %v383_v27 = vadd.f32 %v871_v25, %v382_v26 }
 0x15a   : > { %v965_v28 = vpop.f32.mrf.mxu0 }
 0x15b   : > { %v386_v29 = vmax.f32 %v383_v27, 0.0 }
 0x15d   : > { %966 = vmatprep.subr.mxu0 %v386_v29 }
 0x15e   : > { %967 = vmatpush3.msra.mxu0 %v386_v29 }
 0x15f   : > { %969 = vmatmul.mubr.msk.f32.vlgmr.msra.gmra.mxu0 %vm401_vm5, %v388_v30 }
 0x160   : > { %1000 = vmatprep.mubr.msk.f32.mxu0 %vm401_vm5, %v891_v3 }
 0x21f   : > { %v970_v43 = vpop.f32.mrf.mxu0 }
 0x220   : > { %v480_v44 = vadd.f32 %v970_v43, %v399_v42 }
 0x221   : > { %v474_v46 = vpop.f32.mrf.mxu0 }
 0x222   : > { %v875_v45 = vmul.f32 -1.442695, %v480_v44  ;;  %v475_v50 = vadd.f32 %v474_v46, %v394_v48 }
 0x224   : > { %1060 = vpow2.f32 %v875_v45 }
 0x231   : > { %v1061_v47 = vpop.eup %1060 }
 0x232   : > { %v487_v49 = vadd.f32 1.0, %v1061_v47 }
 0x234   : > { %1062 = vrcp.f32 %v487_v49 }
 0x235   : > { %1064 = vtanh.f32 %v475_v50 }
 0x241   : > { %v1063_v51 = vpop.eup %1062 }
 0x242   : > { %v491_v52 = vsub.f32 1.0, %v1063_v51  ;;  %v1065_v53 = vpop.eup %1064 }
 0x243   : > { %v490_v55 = vmul.f32 %v1065_v53, %v1063_v51 }
 0x244   : > { %v492_v56 = vmul.f32 %v491_v52, %v386_v29 }
 0x246   : > { %v493_v57 = vadd.f32 %v492_v56, %v490_v55 }
 0x248   : > { %494 = vst.msk [vmem:[#allocation2 + $0x1] sm:$0xff] %vm273_vm0, %v493_v57 }
 0x24f   : > { %v497_v58 = vld [vmem:[#allocation2 + $0x2] sm:$0xff] }
 0x250   : > { %v496_v59 = vld [vmem:[#allocation2 + $0x1] sm:$0xff]  ;;  %503 = vrot.lane.b32.xlu1 %v497_v58, %s1137_s8  ;;  %s1078_s8 = scalar_lea.vmem %s1077_s15, 32 }
 0x251   : > { %499 = vrot.lane.b32.xlu0 %v496_v59, %s1136_s20  ;;  %v495_v63 = vld [vmem:[#allocation2] sm:$0xff]  ;;  %s267_s20 = sand.u32 1, %s1124_s25  }
 0x252   : > { %s268_s21 = scalar_lea.vmem [#allocation3], %s267_s20  ;;  %s799_s13 = scalar_lea.sflag [#allocation4], %s267_s20 }
 0x253   : > { %s811_s22 = sshll.u32 %s268_s21, 4  ;;  %s812_s22 = int_to_ptr.vmem [resolvable:$true] %s811_s22 }
 0x254   : > { %611 = vperm.xlu1 %1058, %v893_v60   ;;  %s1072_s14 = scalar_lea.vmem %s812_s22, 16  ;;  %p1079_p0 = scmp.lt.s32.totalorder %s812_s22, %s1077_s15 }
 0x255   : > { %616 = vperm.xlu0 %1059, %v894_v4   ;;  %p1073_p11 = scmp.ne.s32.totalorder %s812_s22, %s1072_s14  ;;  %p1080_p1 = scmp.lt.s32.totalorder %s1078_s8, %s1072_s14 }
 0x257   : > { %p1074_p12 = pnand %p1073_p11, %p1218_p5  ;;  %p1081_p2 = por %p1080_p1, %p1079_p0 }
 0x259   : > { %p1075_p13 = pneg %p1074_p12 }
 0x25b   : > { %p1082_p3 = pnand %p1081_p2, %p1075_p13 }
 0x2c2   : > { %v504_v61 = vpop.permute.xlu1 %503 }
 0x2c3   : > { %v500_v62 = vpop.permute.xlu0 %499 }
 0x2c4   : > { %v506_v0 = vsel %vm273_vm0, %v495_v63, %v500_v62 }
 0x2c5   : > { %v507_v2 = vsel %vm291_vm3, %v506_v0, %v504_v61 }
 0x2c6   : > { %996 = vmatmul.mubr.msk.f32.vlgmr.msra.gmra.mxu1 %vm312_vm4, %v507_v2 }
 0x2c7   : > { %1011 = vmatprep.mubr.msk.f32.mxu1 %vm1135_vm2, %v1134_v1  ;;  %1004 = vmatpush3.msra.mxu1 %v721_v11 }
 0x2c8   : > { %1005 = vmatprep.subr.mxu1 %v1134_v1 }
 0x2c9   : > { %1006 = vmatpush3.msra.mxu1 %v720_v12 }
 0x2ca   : > { %1007 = vmatprep.subr.mxu1 %v1134_v1 }
 0x2cb   : > { %1008 = vmatpush3.msra.mxu1 %v719_v13 }
 0x2cc   : > { %1009 = vmatprep.subr.mxu1 %v1134_v1 }
 0x2cd   : > { %1010 = vmatpush3.msra.mxu1 %v718_v14 }
 0x2cf   : > { %v612_v21 = vpop.permute.xlu1 %611 }
 0x2d0   : > { %v617_v15 = vpop.permute.xlu0 %616 }
 0x386   : > { %v598_v6 = vpop.f32.mrf.mxu1 }
 0x387   : > { %v599_v7 = vadd.f32 %v889_v5, %v598_v6 }
 0x388   : > { %v997_v8 = vpop.f32.mrf.mxu1 }
 0x389   : > { %v602_v9 = vmax.f32 %v599_v7, 0.0 }
 0x38b   : > { %998 = vmatprep.subr.mxu0 %v602_v9 }
 0x38c   : > { %999 = vmatpush3.msra.mxu0 %v602_v9 }
 0x38d   : > { %1001 = vmatmul.mubr.msk.f32.vlgmr.msra.gmra.mxu0 %vm401_vm5, %v892_v10 }
 0x44d   : > { %v1002_v16 = vpop.f32.mrf.mxu0 }
 0x44e   : > { %v697_v17 = vadd.f32 %v1002_v16, %v617_v15 }
 0x44f   : > { %v691_v19 = vpop.f32.mrf.mxu0 }
 0x450   : > { %v897_v18 = vmul.f32 -1.442695, %v697_v17  ;;  %v692_v23 = vadd.f32 %v691_v19, %v612_v21 }
 0x452   : > { %1066 = vpow2.f32 %v897_v18 }
 0x45f   : > { %v1067_v20 = vpop.eup %1066 }
 0x460   : > { %v704_v22 = vadd.f32 1.0, %v1067_v20 }
 0x462   : > { %1068 = vrcp.f32 %v704_v22 }
 0x463   : > { %1070 = vtanh.f32 %v692_v23 }
 0x46f   : > { %v1069_v24 = vpop.eup %1068 }
 0x470   : > { %v708_v25 = vsub.f32 1.0, %v1069_v24  ;;  %v1071_v26 = vpop.eup %1070 }
 0x471   : > { %v707_v27 = vmul.f32 %v1071_v26, %v1069_v24 }
 0x472   : > { %v709_v1 = vmul.f32 %v708_v25, %v602_v9 }
 0x474   : > { %v710_v28 = vadd.f32 %v709_v1, %v707_v27 }
 0x476   : > { %v711_v29 = vsel %vm273_vm0, %v710_v28, -inf }
 0x477   : > { %v712_v30 = vrot.slane %v711_v29, 4 }
 0x479   : > { %v713_v31 = vmax.f32 %v711_v29, %v712_v30 }
 0x47b   : > { %v714_v32 = vrot.slane %v713_v31, 2 }
 0x47d   : > { %v715_v33 = vmax.f32 %v713_v31, %v714_v32 }
 0x47f   : > { %v716_v34 = vrot.slane %v715_v33, 1 }
 0x481   : > { %v717_v35 = vmax.f32 %v715_v33, %v716_v34 }
 0x483   : > { %1012 = vmatmul.mubr.msk.f32.vlgmr.msra.gmra.mxu1 %vm273_vm0, %v717_v35 }
 0x543   : > { %v792_v37 = vpop.f32.mrf.mxu1 }
 0x544   : > { %v793_v38 = vadd.f32 %v792_v37, %v722_v36 }
 0x545   : > { %v1013_v39 = vpop.f32.mrf.mxu1 }
 0x546   : > { %797 = vst.msk [vmem:[%s268_s21] sm:$0x1] %vm796_vm6, %v793_v38 }
 0x547   : > { %1085 = shalt.err (!%p1082_p3)
}
 0x548   : > { %s1086_s16 = scalar_lea.hbm %s1410_s9, 16  ;;  %s1090_s18 = scalar_lea.hbm %s1452_s7, 32 }
 0x549   : > { %p1087_p4 = scmp.ne.s32.totalorder %s1410_s9, %s1086_s16  ;;  %p1091_p9 = scmp.lt.s32.totalorder %s1410_s9, %s1452_s7 }
 0x54a   : > { %p1092_p10 = scmp.lt.s32.totalorder %s1090_s18, %s1086_s16 }
 0x54b   : > { %p1088_p7 = pnand %p1087_p4, %p1218_p5 }
 0x54c   : > { %p1093_p11 = por %p1092_p10, %p1091_p9 }
 0x54d   : > { %p1089_p8 = pneg %p1088_p7 }
 0x54f   : > { %p1094_p12 = pnand %p1093_p11, %p1089_p8 }
 0x551   : > { %1097 = shalt.err (!%p1094_p12)
}
 0x552   : > { %1014 = dma.vmem_to_hbm [thread:$0]  (%p1218_p5), %s812_s22, 16, %s1410_s9, %s799_s13  }
 0x553 PF: > { %p1020_p13 = scmp.ge.s32.totalorder %s1132_s27, 2  ;;  %s823_s23 = sand.u32 1, %s1120_s24  }
 0x554   : > { %s824_s29 = scalar_lea.sflag [#allocation4], %s823_s23 }
 0x555   : > { %p1017_p0 = pnand %p1020_p13, %p1222_p6 }
 0x557   : > { %p1018_p1 = pneg %p1017_p0 }
 0x559   : > { %1115 = dma.done.wait (%p1018_p1), %s824_s29, 16  }
 0x55a   : > { %1117 = vsyncadd (%p1018_p1), %s824_s29, 4294967280  ;;  %p17_p2 = scmp.ge.s32.totalorder %s1205_s30, 4   ;;  %s1455_s24 = smov %s1124_s25 }
 0x55b   : > { %s1456_s25 = smov %s1128_s26  ;;  %s1457_s26 = smov %s1216_s10 }
 0x55c   : > { %s1458_s27 = smov %s1205_s30  ;;  %19 = sbr.rel (!%p17_p2) target bundleno = 3 (0x3), region = 87 }
 0x561   :  { %828 = vsyncpa [#allocation4], 1 }
 0x562   :  { %830 = vsyncpa [#allocation4 + $0x1], 1 }

</bundles_post_ra>
